<compile_context>
chip_gen: v5e
topology: v5e:2x2
jax: 0.10.0
libtpu: 0.0.40
codegen_flags: <defaults>
</compile_context>

<pallas_src>
import functools
import math

import jax
import jax.numpy as jnp
from jax.experimental import pallas as pl
from jax.experimental.pallas import tpu as pltpu

LRELU_SLOPE = 0.2
LRELU_GAIN = math.sqrt(2.0)


def _lrelu(x):
    return jnp.where(x >= 0, x, LRELU_SLOPE * x) * LRELU_GAIN


def _mapping_math(z, w1, b1, w2, b2):
    # StyleGAN2 mapping: pixel-norm then 2x (FC + lrelu*sqrt(2)). All f32.
    z = z * jax.lax.rsqrt(jnp.mean(z * z, axis=-1, keepdims=True) + 1e-8)
    h = _lrelu(jnp.dot(z, w1, preferred_element_type=jnp.float32) + b1)
    return _lrelu(jnp.dot(h, w2, preferred_element_type=jnp.float32) + b2)


# ---------------------------------------------------------------------------
# Standalone mapping kernel (used by get_w). Whole problem fits VMEM: no grid.
# ---------------------------------------------------------------------------
def _mapping_kernel(z_ref, w1_ref, b1_ref, w2_ref, b2_ref, out_ref):
    out_ref[...] = _mapping_math(
        z_ref[...].astype(jnp.float32), w1_ref[...], b1_ref[...],
        w2_ref[...], b2_ref[...]).astype(out_ref.dtype)


def mapping_forward(z, params):
    B = z.shape[0]
    dim_w = params["map_w2"].shape[1]
    return pl.pallas_call(
        _mapping_kernel,
        out_shape=jax.ShapeDtypeStruct((B, dim_w), jnp.float32),
    )(z, params["map_w1"], params["map_b1"], params["map_w2"], params["map_b2"])


# ---------------------------------------------------------------------------
# Fused per-sample kernel: mapping + shift + weight-modulated conv + toRGB.
# One grid step = one sample; params / packed constant use batch-invariant
# index_maps so they stay resident in VMEM across the whole batch.
# ---------------------------------------------------------------------------
def _fused_kernel(z_ref, shift_ref,
                  mw1_ref, mb1_ref, mw2_ref, mb2_ref,
                  a1w_ref, a1b_ref, w2sT_ref, cwT_ref, cb_ref, xfT_ref,
                  a2w_ref, a2b_ref, rgbw_ref, rgbb_ref,
                  out_ref, *, apply_mapping, shift_in_w):
    lat = z_ref[0].astype(jnp.float32)            # [1, Dz]  (z, or w if latent_is_w)
    shift = shift_ref[0].astype(jnp.float32)      # [1, Dshift]

    # ---- latent -> w (mapping fused; shift added in Z- or W-space) ----
    if apply_mapping:
        zin = lat if shift_in_w else lat + shift
        w = _mapping_math(zin, mw1_ref[...], mb1_ref[...], mw2_ref[...], mb2_ref[...])
        if shift_in_w:
            w = w + shift
    else:                                         # latent_is_w: z already is w
        w = lat + shift

    # ---- style affine + demodulation (f32, VPU/EUP; tiny) ----
    s1 = jnp.dot(w, a1w_ref[...], preferred_element_type=jnp.float32) + a1b_ref[...]   # [1,Cin]
    # tap-repeated style row; 9*Cin values total, negligible next to the weight modulation
    s1t = jnp.concatenate([s1] * 9, axis=-1)                                           # [1,9Cin]
    # demod factor directly as a COLUMN: row-broadcast multiply + lane reduction
    # (no in-kernel transposes anywhere)
    dcol = jax.lax.rsqrt(
        jnp.sum(w2sT_ref[...] * (s1 * s1), axis=1, keepdims=True) + 1e-8)              # [Cout,1]

    # ---- modulated+demodulated 3x3 conv: modulate the WEIGHT, one bf16 MXU matmul ----
    wmodT = (cwT_ref[...] * s1t * dcol).astype(jnp.bfloat16)                           # [Cout,9Cin]
    accT = jnp.dot(wmodT, xfT_ref[...], preferred_element_type=jnp.float32)            # [Cout,HW]
    yT = _lrelu(accT + cb_ref[...])                                                    # [Cout,HW]

    # ---- toRGB: fold s2 into the RGB weight, single MXU contraction over Cout ----
    s2 = jnp.dot(w, a2w_ref[...], preferred_element_type=jnp.float32) + a2b_ref[...]   # [1,Cout]
    rgb_eff = (rgbw_ref[...] * s2).astype(jnp.bfloat16)                                # [n_rgb,Cout]
    img = jnp.dot(rgb_eff, yT.astype(jnp.bfloat16),
                  preferred_element_type=jnp.float32) + rgbb_ref[...]                  # [n_rgb,HW]

    # Single lane-dense store, HW in the lane dim, channel-major output.
    # (Output stays f32; could be bf16 if downstream tolerates it.)
    out_ref[0] = img.astype(out_ref.dtype)


@functools.partial(jax.jit, static_argnames=("apply_mapping", "shift_in_w", "n_rgb"))
def fused_forward(z, shift, params, *, apply_mapping, shift_in_w, n_rgb):
    B, dz = z.shape
    ds = shift.shape[1]
    HW = params["xfT"].shape[1]

    # (B, 1, D) so per-sample blocks have full last-two dims (layout-safe blocks).
    z3 = z.reshape(B, 1, dz)
    s3 = shift.reshape(B, 1, ds)

    # torch.index_select(out, 1, [0]) fused: only pass the RGB rows we actually compute.
    rgbw_n = params["rgbT"][:n_rgb]
    rgbb_n = params["rgb_b"][:n_rgb]

    param_arrays = (params["map_w1"], params["map_b1"], params["map_w2"], params["map_b2"],
                    params["aff1_w"], params["aff1_b"], params["conv_w2T"], params["conv_wT"],
                    params["conv_b"], params["xfT"],
                    params["aff2_w"], params["aff2_b"], rgbw_n, rgbb_n)

    def const_spec(a):
        nd = a.ndim
        # Batch-invariant index_map: DMA'd once, reused for every sample of the batch.
        return pl.BlockSpec(a.shape, lambda b, _nd=nd: (0,) * _nd)

    kern = functools.partial(_fused_kernel, apply_mapping=apply_mapping,
                             shift_in_w=shift_in_w)
    return pl.pallas_call(
        kern,
        grid=(B,),
        in_specs=[pl.BlockSpec((1, 1, dz), lambda b: (b, 0, 0)),
                  pl.BlockSpec((1, 1, ds), lambda b: (b, 0, 0))]
                 + [const_spec(a) for a in param_arrays],
        out_specs=pl.BlockSpec((1, n_rgb, HW), lambda b: (b, 0, 0)),
        out_shape=jax.ShapeDtypeStruct((B, n_rgb, HW), jnp.float32),
        compiler_params=pltpu.CompilerParams(dimension_semantics=("parallel",)),
    )(z3, s3, *param_arrays)


# ---------------------------------------------------------------------------
# Deterministic synthetic generator parameters (host-side packing, not hot path)
# ---------------------------------------------------------------------------
def init_params(key, dim_z, dim_w, cin, cout, H, W):
    ks = jax.random.split(key, 8)
    n = jax.random.normal
    p = {}
    # mapping network (2 FC layers)
    p["map_w1"] = n(ks[0], (dim_z, dim_w), jnp.float32) / math.sqrt(dim_z)
    p["map_b1"] = jnp.zeros((1, dim_w), jnp.float32)
    p["map_w2"] = n(ks[1], (dim_w, dim_w), jnp.float32) / math.sqrt(dim_w)
    p["map_b2"] = jnp.zeros((1, dim_w), jnp.float32)

    # learned constant input [Cin, H, W]; pack its nine shifted 3x3 taps TRANSPOSED into
    # [9*Cin, HW] (tap-major rows, HW in the lane dim) so the conv is accT = wmodT @ xfT
    # and the result is already channel-major. Stored bf16 (MXU operand).
    const = n(ks[2], (cin, H, W), jnp.float32)
    cpad = jnp.pad(const, ((0, 0), (1, 1), (1, 1)))                     # [Cin, H+2, W+2]
    taps = [cpad[:, dy:dy + H, dx:dx + W].reshape(cin, H * W)
            for dy in range(3) for dx in range(3)]
    p["xfT"] = jnp.concatenate(taps, axis=0).astype(jnp.bfloat16)       # [9*Cin, HW]

    # modulated 3x3 conv layer; weight kept f32 and stored transposed [Cout, 9*Cin] so the
    # per-sample style/demod modulation happens on the weight (Cout*9Cin ops, not HW*9Cin).
    p["aff1_w"] = n(ks[3], (dim_w, cin), jnp.float32) / math.sqrt(dim_w)
    p["aff1_b"] = jnp.ones((1, cin), jnp.float32)          # style bias init = 1 (StyleGAN2)
    conv_w = n(ks[4], (3, 3, cin, cout), jnp.float32) / math.sqrt(cin * 9)
    p["conv_wT"] = conv_w.reshape(9 * cin, cout).T                       # [Cout, 9*Cin] f32
    p["conv_w2T"] = jnp.sum(conv_w.reshape(9, cin, cout) ** 2, axis=0).T  # [Cout, Cin] demod
    p["conv_b"] = jnp.zeros((cout, 1), jnp.float32)                      # column bias

    # toRGB (1x1 modulated conv, no demod/activation); weight stored [3, Cout] so only the
    # requested channels are passed in and computed, output lands channel-major.
    p["aff2_w"] = n(ks[5], (dim_w, cout), jnp.float32) / math.sqrt(dim_w)
    p["aff2_b"] = jnp.ones((1, cout), jnp.float32)
    p["rgbT"] = (n(ks[6], (cout, 3), jnp.float32) / math.sqrt(cout)).T   # [3, Cout]
    p["rgb_b"] = jnp.zeros((3, 1), jnp.float32)
    return p


# ---------------------------------------------------------------------------
# Wrapper mirroring StyleGAN2Wrapper.forward / get_w
# ---------------------------------------------------------------------------
class StyleGAN2WrapperPallas:
    def __init__(self, params, shift_in_w_space, dim_z, dim_w, num_ws=2):
        self.params = params
        self.shift_in_w_space = shift_in_w_space
        self.dim_z = dim_z
        self.dim_w = dim_w if shift_in_w_space else dim_z
        # w.unsqueeze(1).repeat(1, num_ws, 1): all num_ws rows identical; this
        # single-style synthetic synthesis consumes one w per sample.
        self.num_ws = num_ws
        self.resolution = int(math.isqrt(params["xfT"].shape[1]))

    def get_w(self, z):
        # G.mapping broadcasts w over num_ws; map_for_stylegan takes row 0 -> [B, Dw].
        return mapping_forward(z, self.params)

    def forward(self, z, shift=None, latent_is_w=False):
        if shift is not None and shift.ndim == 4:
            shift = shift[:, :, 0, 0]                        # squeeze(3).squeeze(2)
        B = z.shape[0]
        if shift is None:                                    # "w = w": add zeros instead
            if self.shift_in_w_space and not latent_is_w:
                shift = jnp.zeros((B, self.params["map_w2"].shape[1]), jnp.float32)
            else:
                shift = jnp.zeros_like(z)
        apply_mapping = not (self.shift_in_w_space and latent_is_w)
        # torch.index_select(out, 1, [0]) of the shift-in-W branch is fused into the
        # kernel: only RGB channel 0 is computed and written.
        n_rgb = 1 if self.shift_in_w_space else 3
        out = fused_forward(z, shift, self.params,
                            apply_mapping=apply_mapping,
                            shift_in_w=self.shift_in_w_space, n_rgb=n_rgb)
        H = W = self.resolution
        # Kernel output is channel-major [B, n_rgb, HW]: NCHW is a pure reshape.
        return out.reshape(B, n_rgb, H, W)


if __name__ == "__main__":
    B, DZ, DW, CIN, COUT, H, W = 2, 32, 32, 32, 32, 8, 8
    key = jax.random.PRNGKey(0)
    kz, ks, kp = jax.random.split(key, 3)

    params = init_params(kp, DZ, DW, CIN, COUT, H, W)
    z = jax.random.normal(kz, (B, DZ), jnp.float32)
    shift_w = 0.1 * jax.random.normal(ks, (B, DW, 1, 1), jnp.float32)   # 4D shift path

    # shift-in-W-space branch (index_select fused -> [B, 1, H, W])
    Gw = StyleGAN2WrapperPallas(params, shift_in_w_space=True, dim_z=DZ, dim_w=DW)
    out_w = jax.block_until_ready(Gw.forward(z, shift_w))
    assert out_w.shape == (B, 1, H, W), out_w.shape
    assert bool(jnp.all(jnp.isfinite(out_w)))

    # latent-is-w path (mapping skipped inside the fused kernel)
    w_lat = jax.block_until_ready(Gw.get_w(z))
    assert w_lat.shape == (B, DW), w_lat.shape
    out_lw = jax.block_until_ready(Gw.forward(w_lat, shift_w, latent_is_w=True))
    assert out_lw.shape == (B, 1, H, W), out_lw.shape

    # shift-in-Z-space branch (full generator output [B, 3, H, W])
    Gz = StyleGAN2WrapperPallas(params, shift_in_w_space=False, dim_z=DZ, dim_w=DW)
    shift_z = 0.1 * jax.random.normal(ks, (B, DZ), jnp.float32)
    out_z = jax.block_until_ready(Gz.forward(z, shift_z))
    assert out_z.shape == (B, 3, H, W), out_z.shape
    assert bool(jnp.all(jnp.isfinite(out_z)))

    # no-shift path
    out_ns = jax.block_until_ready(Gz.forward(z))
    assert out_ns.shape == (B, 3, H, W), out_ns.shape

    print("KERNEL_OK")
</pallas_src>

<mosaic_0001>
module attributes {stable_mosaic.version = 11 : i64} {
  func.func @_fused_kernel(%arg0: i32, %arg1: memref<1x1x32xf32, #tpu.memory_space<vmem>>, %arg2: memref<1x1x32xf32, #tpu.memory_space<vmem>>, %arg3: memref<32x32xf32, #tpu.memory_space<vmem>>, %arg4: memref<1x32xf32, #tpu.memory_space<vmem>>, %arg5: memref<32x32xf32, #tpu.memory_space<vmem>>, %arg6: memref<1x32xf32, #tpu.memory_space<vmem>>, %arg7: memref<32x32xf32, #tpu.memory_space<vmem>>, %arg8: memref<1x32xf32, #tpu.memory_space<vmem>>, %arg9: memref<32x32xf32, #tpu.memory_space<vmem>>, %arg10: memref<32x288xf32, #tpu.memory_space<vmem>>, %arg11: memref<32x1xf32, #tpu.memory_space<vmem>>, %arg12: memref<288x64xbf16, #tpu.memory_space<vmem>>, %arg13: memref<32x32xf32, #tpu.memory_space<vmem>>, %arg14: memref<1x32xf32, #tpu.memory_space<vmem>>, %arg15: memref<1x32xf32, #tpu.memory_space<vmem>>, %arg16: memref<1x1xf32, #tpu.memory_space<vmem>>, %arg17: memref<1x1x64xf32, #tpu.memory_space<vmem>>) attributes {dimension_semantics = [#tpu.dimension_semantics<parallel>], iteration_bounds = array<i64: 2>, scalar_prefetch = 0 : i64, scratch_operands = 0 : i64, tpu.core_type = #tpu.core_type<tc>, window_params = [{transform_indices = @transform_0, window_bounds = array<i64: 1, 1, 32>}, {transform_indices = @transform_1, window_bounds = array<i64: 1, 1, 32>}, {pipeline_mode = #tpu.pipeline_mode<synchronous>, transform_indices = @transform_2, window_bounds = array<i64: 32, 32>}, {pipeline_mode = #tpu.pipeline_mode<synchronous>, transform_indices = @transform_3, window_bounds = array<i64: 1, 32>}, {pipeline_mode = #tpu.pipeline_mode<synchronous>, transform_indices = @transform_4, window_bounds = array<i64: 32, 32>}, {pipeline_mode = #tpu.pipeline_mode<synchronous>, transform_indices = @transform_5, window_bounds = array<i64: 1, 32>}, {pipeline_mode = #tpu.pipeline_mode<synchronous>, transform_indices = @transform_6, window_bounds = array<i64: 32, 32>}, {pipeline_mode = #tpu.pipeline_mode<synchronous>, transform_indices = @transform_7, window_bounds = array<i64: 1, 32>}, {pipeline_mode = #tpu.pipeline_mode<synchronous>, transform_indices = @transform_8, window_bounds = array<i64: 32, 32>}, {pipeline_mode = #tpu.pipeline_mode<synchronous>, transform_indices = @transform_9, window_bounds = array<i64: 32, 288>}, {pipeline_mode = #tpu.pipeline_mode<synchronous>, transform_indices = @transform_10, window_bounds = array<i64: 32, 1>}, {pipeline_mode = #tpu.pipeline_mode<synchronous>, transform_indices = @transform_11, window_bounds = array<i64: 288, 64>}, {pipeline_mode = #tpu.pipeline_mode<synchronous>, transform_indices = @transform_12, window_bounds = array<i64: 32, 32>}, {pipeline_mode = #tpu.pipeline_mode<synchronous>, transform_indices = @transform_13, window_bounds = array<i64: 1, 32>}, {pipeline_mode = #tpu.pipeline_mode<synchronous>, transform_indices = @transform_14, window_bounds = array<i64: 1, 32>}, {pipeline_mode = #tpu.pipeline_mode<synchronous>, transform_indices = @transform_15, window_bounds = array<i64: 1, 1>}, {transform_indices = @transform_16, window_bounds = array<i64: 1, 1, 64>}]} {
    %c0 = arith.constant 0 : index
    %c0_0 = arith.constant 0 : index
    %c0_1 = arith.constant 0 : index
    %0 = vector.load %arg1[%c0, %c0_0, %c0_1] : memref<1x1x32xf32, #tpu.memory_space<vmem>>, vector<1x1x32xf32>
    %1 = vector.shape_cast %0 : vector<1x1x32xf32> to vector<1x32xf32>
    %c0_2 = arith.constant 0 : index
    %c0_3 = arith.constant 0 : index
    %c0_4 = arith.constant 0 : index
    %2 = vector.load %arg2[%c0_2, %c0_3, %c0_4] : memref<1x1x32xf32, #tpu.memory_space<vmem>>, vector<1x1x32xf32>
    %3 = vector.shape_cast %2 : vector<1x1x32xf32> to vector<1x32xf32>
    %c0_5 = arith.constant 0 : index
    %c0_6 = arith.constant 0 : index
    %4 = vector.load %arg3[%c0_5, %c0_6] : memref<32x32xf32, #tpu.memory_space<vmem>>, vector<32x32xf32>
    %c0_7 = arith.constant 0 : index
    %c0_8 = arith.constant 0 : index
    %5 = vector.load %arg4[%c0_7, %c0_8] : memref<1x32xf32, #tpu.memory_space<vmem>>, vector<1x32xf32>
    %c0_9 = arith.constant 0 : index
    %c0_10 = arith.constant 0 : index
    %6 = vector.load %arg5[%c0_9, %c0_10] : memref<32x32xf32, #tpu.memory_space<vmem>>, vector<32x32xf32>
    %c0_11 = arith.constant 0 : index
    %c0_12 = arith.constant 0 : index
    %7 = vector.load %arg6[%c0_11, %c0_12] : memref<1x32xf32, #tpu.memory_space<vmem>>, vector<1x32xf32>
    %8 = arith.mulf %1, %1 : vector<1x32xf32>
    %cst = arith.constant dense<0.000000e+00> : vector<1xf32>
    %9 = vector.multi_reduction <add>, %8, %cst [1] : vector<1x32xf32> to vector<1xf32>
    %10 = vector.shape_cast %9 : vector<1xf32> to vector<1x1xf32>
    %cst_13 = arith.constant 3.200000e+01 : f32
    %11 = vector.broadcast %cst_13 : f32 to vector<1x1xf32>
    %12 = arith.divf %10, %11 : vector<1x1xf32>
    %cst_14 = arith.constant 9.99999993E-9 : f32
    %13 = vector.broadcast %cst_14 : f32 to vector<1x1xf32>
    %14 = arith.addf %12, %13 : vector<1x1xf32>
    %15 = math.rsqrt %14 : vector<1x1xf32>
    %16 = vector.broadcast %15 : vector<1x1xf32> to vector<1x32xf32>
    %17 = arith.mulf %1, %16 : vector<1x32xf32>
    %cst_15 = arith.constant dense<0.000000e+00> : vector<1x32xf32>
    %18 = tpu.matmul %17, %4, %cst_15 {dimension_numbers = #tpu.dot_dimension_numbers<[1], [0], [0], [1], [0, 0, 1, 1], [], []>} : vector<1x32xf32>, vector<32x32xf32>, vector<1x32xf32> -> vector<1x32xf32>
    %19 = arith.addf %18, %5 : vector<1x32xf32>
    %cst_16 = arith.constant 0.000000e+00 : f32
    %20 = vector.broadcast %cst_16 : f32 to vector<1x32xf32>
    %21 = arith.cmpf oge, %19, %20 : vector<1x32xf32>
    %cst_17 = arith.constant 2.000000e-01 : f32
    %22 = vector.broadcast %cst_17 : f32 to vector<1x32xf32>
    %23 = arith.mulf %22, %19 : vector<1x32xf32>
    %24 = arith.select %21, %19, %23 : vector<1x32xi1>, vector<1x32xf32>
    %cst_18 = arith.constant 1.41421354 : f32
    %25 = vector.broadcast %cst_18 : f32 to vector<1x32xf32>
    %26 = arith.mulf %24, %25 : vector<1x32xf32>
    %cst_19 = arith.constant dense<0.000000e+00> : vector<1x32xf32>
    %27 = tpu.matmul %26, %6, %cst_19 {dimension_numbers = #tpu.dot_dimension_numbers<[1], [0], [0], [1], [0, 0, 1, 1], [], []>} : vector<1x32xf32>, vector<32x32xf32>, vector<1x32xf32> -> vector<1x32xf32>
    %28 = arith.addf %27, %7 : vector<1x32xf32>
    %cst_20 = arith.constant 0.000000e+00 : f32
    %29 = vector.broadcast %cst_20 : f32 to vector<1x32xf32>
    %30 = arith.cmpf oge, %28, %29 : vector<1x32xf32>
    %cst_21 = arith.constant 2.000000e-01 : f32
    %31 = vector.broadcast %cst_21 : f32 to vector<1x32xf32>
    %32 = arith.mulf %31, %28 : vector<1x32xf32>
    %33 = arith.select %30, %28, %32 : vector<1x32xi1>, vector<1x32xf32>
    %cst_22 = arith.constant 1.41421354 : f32
    %34 = vector.broadcast %cst_22 : f32 to vector<1x32xf32>
    %35 = arith.mulf %33, %34 : vector<1x32xf32>
    %36 = arith.addf %35, %3 : vector<1x32xf32>
    %c0_23 = arith.constant 0 : index
    %c0_24 = arith.constant 0 : index
    %37 = vector.load %arg7[%c0_23, %c0_24] : memref<32x32xf32, #tpu.memory_space<vmem>>, vector<32x32xf32>
    %cst_25 = arith.constant dense<0.000000e+00> : vector<1x32xf32>
    %38 = tpu.matmul %36, %37, %cst_25 {dimension_numbers = #tpu.dot_dimension_numbers<[1], [0], [0], [1], [0, 0, 1, 1], [], []>} : vector<1x32xf32>, vector<32x32xf32>, vector<1x32xf32> -> vector<1x32xf32>
    %c0_26 = arith.constant 0 : index
    %c0_27 = arith.constant 0 : index
    %39 = vector.load %arg8[%c0_26, %c0_27] : memref<1x32xf32, #tpu.memory_space<vmem>>, vector<1x32xf32>
    %40 = arith.addf %38, %39 : vector<1x32xf32>
    %41 = tpu.concatenate %40, %40, %40, %40, %40, %40, %40, %40, %40 in 1 : vector<1x32xf32>, vector<1x32xf32>, vector<1x32xf32>, vector<1x32xf32>, vector<1x32xf32>, vector<1x32xf32>, vector<1x32xf32>, vector<1x32xf32>, vector<1x32xf32> -> vector<1x288xf32>
    %c0_28 = arith.constant 0 : index
    %c0_29 = arith.constant 0 : index
    %42 = vector.load %arg9[%c0_28, %c0_29] : memref<32x32xf32, #tpu.memory_space<vmem>>, vector<32x32xf32>
    %43 = arith.mulf %40, %40 : vector<1x32xf32>
    %44 = vector.broadcast %43 : vector<1x32xf32> to vector<32x32xf32>
    %45 = arith.mulf %42, %44 : vector<32x32xf32>
    %cst_30 = arith.constant dense<0.000000e+00> : vector<32xf32>
    %46 = vector.multi_reduction <add>, %45, %cst_30 [1] : vector<32x32xf32> to vector<32xf32>
    %47 = vector.shape_cast %46 : vector<32xf32> to vector<32x1xf32>
    %cst_31 = arith.constant 9.99999993E-9 : f32
    %48 = vector.broadcast %cst_31 : f32 to vector<32x1xf32>
    %49 = arith.addf %47, %48 : vector<32x1xf32>
    %50 = math.rsqrt %49 : vector<32x1xf32>
    %c0_32 = arith.constant 0 : index
    %c0_33 = arith.constant 0 : index
    %51 = vector.load %arg10[%c0_32, %c0_33] : memref<32x288xf32, #tpu.memory_space<vmem>>, vector<32x288xf32>
    %52 = vector.broadcast %41 : vector<1x288xf32> to vector<32x288xf32>
    %53 = arith.mulf %51, %52 : vector<32x288xf32>
    %54 = vector.broadcast %50 : vector<32x1xf32> to vector<32x288xf32>
    %55 = arith.mulf %53, %54 : vector<32x288xf32>
    %56 = arith.truncf %55 : vector<32x288xf32> to vector<32x288xbf16>
    %c0_34 = arith.constant 0 : index
    %c0_35 = arith.constant 0 : index
    %57 = vector.load %arg12[%c0_34, %c0_35] : memref<288x64xbf16, #tpu.memory_space<vmem>>, vector<288x64xbf16>
    %cst_36 = arith.constant dense<0.000000e+00> : vector<32x64xf32>
    %58 = tpu.matmul %56, %57, %cst_36 {dimension_numbers = #tpu.dot_dimension_numbers<[1], [0], [0], [1], [0, 0, 1, 1], [], []>} : vector<32x288xbf16>, vector<288x64xbf16>, vector<32x64xf32> -> vector<32x64xf32>
    %c0_37 = arith.constant 0 : index
    %c0_38 = arith.constant 0 : index
    %59 = vector.load %arg11[%c0_37, %c0_38] : memref<32x1xf32, #tpu.memory_space<vmem>>, vector<32x1xf32>
    %60 = vector.broadcast %59 : vector<32x1xf32> to vector<32x64xf32>
    %61 = arith.addf %58, %60 : vector<32x64xf32>
    %cst_39 = arith.constant 0.000000e+00 : f32
    %62 = vector.broadcast %cst_39 : f32 to vector<32x64xf32>
    %63 = arith.cmpf oge, %61, %62 : vector<32x64xf32>
    %cst_40 = arith.constant 2.000000e-01 : f32
    %64 = vector.broadcast %cst_40 : f32 to vector<32x64xf32>
    %65 = arith.mulf %64, %61 : vector<32x64xf32>
    %66 = arith.select %63, %61, %65 : vector<32x64xi1>, vector<32x64xf32>
    %cst_41 = arith.constant 1.41421354 : f32
    %67 = vector.broadcast %cst_41 : f32 to vector<32x64xf32>
    %68 = arith.mulf %66, %67 : vector<32x64xf32>
    %c0_42 = arith.constant 0 : index
    %c0_43 = arith.constant 0 : index
    %69 = vector.load %arg13[%c0_42, %c0_43] : memref<32x32xf32, #tpu.memory_space<vmem>>, vector<32x32xf32>
    %cst_44 = arith.constant dense<0.000000e+00> : vector<1x32xf32>
    %70 = tpu.matmul %36, %69, %cst_44 {dimension_numbers = #tpu.dot_dimension_numbers<[1], [0], [0], [1], [0, 0, 1, 1], [], []>} : vector<1x32xf32>, vector<32x32xf32>, vector<1x32xf32> -> vector<1x32xf32>
    %c0_45 = arith.constant 0 : index
    %c0_46 = arith.constant 0 : index
    %71 = vector.load %arg14[%c0_45, %c0_46] : memref<1x32xf32, #tpu.memory_space<vmem>>, vector<1x32xf32>
    %72 = arith.addf %70, %71 : vector<1x32xf32>
    %c0_47 = arith.constant 0 : index
    %c0_48 = arith.constant 0 : index
    %73 = vector.load %arg15[%c0_47, %c0_48] : memref<1x32xf32, #tpu.memory_space<vmem>>, vector<1x32xf32>
    %74 = arith.mulf %73, %72 : vector<1x32xf32>
    %75 = arith.truncf %74 : vector<1x32xf32> to vector<1x32xbf16>
    %76 = arith.truncf %68 : vector<32x64xf32> to vector<32x64xbf16>
    %cst_49 = arith.constant dense<0.000000e+00> : vector<1x64xf32>
    %77 = tpu.matmul %75, %76, %cst_49 {dimension_numbers = #tpu.dot_dimension_numbers<[1], [0], [0], [1], [0, 0, 1, 1], [], []>} : vector<1x32xbf16>, vector<32x64xbf16>, vector<1x64xf32> -> vector<1x64xf32>
    %c0_50 = arith.constant 0 : index
    %c0_51 = arith.constant 0 : index
    %78 = vector.load %arg16[%c0_50, %c0_51] : memref<1x1xf32, #tpu.memory_space<vmem>>, vector<1x1xf32>
    %79 = vector.broadcast %78 : vector<1x1xf32> to vector<1x64xf32>
    %80 = arith.addf %77, %79 : vector<1x64xf32>
    %c0_52 = arith.constant 0 : index
    %c0_53 = arith.constant 0 : index
    %c0_54 = arith.constant 0 : index
    %81 = vector.load %arg17[%c0_52, %c0_53, %c0_54] : memref<1x1x64xf32, #tpu.memory_space<vmem>>, vector<1x1x64xf32>
    %82 = vector.shape_cast %81 : vector<1x1x64xf32> to vector<1x64xf32>
    %83 = vector.shape_cast %80 : vector<1x64xf32> to vector<1x1x64xf32>
    tpu.vector_store %arg17[%c0_52, %c0_53, %c0_54], %83 {strides = array<i32>} : memref<1x1x64xf32, #tpu.memory_space<vmem>>, vector<1x1x64xf32>,
    return
  }
  func.func @transform_0(%arg0: i32) -> (i32, i32, i32) {
    %c0_i32 = arith.constant 0 : i32
    %c0_i32_0 = arith.constant 0 : i32
    %c0_i32_1 = arith.constant 0 : i32
    return %arg0, %c0_i32, %c0_i32_0 : i32, i32, i32
  }
  func.func @transform_1(%arg0: i32) -> (i32, i32, i32) {
    %c0_i32 = arith.constant 0 : i32
    %c0_i32_0 = arith.constant 0 : i32
    %c0_i32_1 = arith.constant 0 : i32
    return %arg0, %c0_i32, %c0_i32_0 : i32, i32, i32
  }
  func.func @transform_2(%arg0: i32) -> (i32, i32) {
    %c0_i32 = arith.constant 0 : i32
    %c0_i32_0 = arith.constant 0 : i32
    %c0_i32_1 = arith.constant 0 : i32
    return %c0_i32, %c0_i32_0 : i32, i32
  }
  func.func @transform_3(%arg0: i32) -> (i32, i32) {
    %c0_i32 = arith.constant 0 : i32
    %c0_i32_0 = arith.constant 0 : i32
    %c0_i32_1 = arith.constant 0 : i32
    return %c0_i32, %c0_i32_0 : i32, i32
  }
  func.func @transform_4(%arg0: i32) -> (i32, i32) {
    %c0_i32 = arith.constant 0 : i32
    %c0_i32_0 = arith.constant 0 : i32
    %c0_i32_1 = arith.constant 0 : i32
    return %c0_i32, %c0_i32_0 : i32, i32
  }
  func.func @transform_5(%arg0: i32) -> (i32, i32) {
    %c0_i32 = arith.constant 0 : i32
    %c0_i32_0 = arith.constant 0 : i32
    %c0_i32_1 = arith.constant 0 : i32
    return %c0_i32, %c0_i32_0 : i32, i32
  }
  func.func @transform_6(%arg0: i32) -> (i32, i32) {
    %c0_i32 = arith.constant 0 : i32
    %c0_i32_0 = arith.constant 0 : i32
    %c0_i32_1 = arith.constant 0 : i32
    return %c0_i32, %c0_i32_0 : i32, i32
  }
  func.func @transform_7(%arg0: i32) -> (i32, i32) {
    %c0_i32 = arith.constant 0 : i32
    %c0_i32_0 = arith.constant 0 : i32
    %c0_i32_1 = arith.constant 0 : i32
    return %c0_i32, %c0_i32_0 : i32, i32
  }
  func.func @transform_8(%arg0: i32) -> (i32, i32) {
    %c0_i32 = arith.constant 0 : i32
    %c0_i32_0 = arith.constant 0 : i32
    %c0_i32_1 = arith.constant 0 : i32
    return %c0_i32, %c0_i32_0 : i32, i32
  }
  func.func @transform_9(%arg0: i32) -> (i32, i32) {
    %c0_i32 = arith.constant 0 : i32
    %c0_i32_0 = arith.constant 0 : i32
    %c0_i32_1 = arith.constant 0 : i32
    return %c0_i32, %c0_i32_0 : i32, i32
  }
  func.func @transform_10(%arg0: i32) -> (i32, i32) {
    %c0_i32 = arith.constant 0 : i32
    %c0_i32_0 = arith.constant 0 : i32
    %c0_i32_1 = arith.constant 0 : i32
    return %c0_i32, %c0_i32_0 : i32, i32
  }
  func.func @transform_11(%arg0: i32) -> (i32, i32) {
    %c0_i32 = arith.constant 0 : i32
    %c0_i32_0 = arith.constant 0 : i32
    %c0_i32_1 = arith.constant 0 : i32
    return %c0_i32, %c0_i32_0 : i32, i32
  }
  func.func @transform_12(%arg0: i32) -> (i32, i32) {
    %c0_i32 = arith.constant 0 : i32
    %c0_i32_0 = arith.constant 0 : i32
    %c0_i32_1 = arith.constant 0 : i32
    return %c0_i32, %c0_i32_0 : i32, i32
  }
  func.func @transform_13(%arg0: i32) -> (i32, i32) {
    %c0_i32 = arith.constant 0 : i32
    %c0_i32_0 = arith.constant 0 : i32
    %c0_i32_1 = arith.constant 0 : i32
    return %c0_i32, %c0_i32_0 : i32, i32
  }
  func.func @transform_14(%arg0: i32) -> (i32, i32) {
    %c0_i32 = arith.constant 0 : i32
    %c0_i32_0 = arith.constant 0 : i32
    %c0_i32_1 = arith.constant 0 : i32
    return %c0_i32, %c0_i32_0 : i32, i32
  }
  func.func @transform_15(%arg0: i32) -> (i32, i32) {
    %c0_i32 = arith.constant 0 : i32
    %c0_i32_0 = arith.constant 0 : i32
    %c0_i32_1 = arith.constant 0 : i32
    return %c0_i32, %c0_i32_0 : i32, i32
  }
  func.func @transform_16(%arg0: i32) -> (i32, i32, i32) {
    %c0_i32 = arith.constant 0 : i32
    %c0_i32_0 = arith.constant 0 : i32
    %c0_i32_1 = arith.constant 0 : i32
    return %arg0, %c0_i32, %c0_i32_0 : i32, i32, i32
  }
}

</mosaic_0001>

<bundles_post_ra>
// kernel: fused_forward.1
= control target key start
LH: loop header
LB: loop body
LE: loop exit
PB: predicated region body
PF: predicated region fallthrough
CT: control target
= control target key end

     0   :  { %s1766_s0 = inlined_call_operand.vmem [shape: f32[2,1,32], index: 0, kind: input, shape index: {}]   ;;  %s1767_s1 = inlined_call_operand.vmem [shape: f32[2,1,32], index: 1, kind: input, shape index: {}]   ;;  %s1768_s2 = inlined_call_operand.vmem [shape: f32[32,32], index: 2, kind: input, shape index: {}]   ;;  %s1769_s3 = inlined_call_operand.vmem [shape: f32[1,32], index: 3, kind: input, shape index: {}]   ;;  %s1770_s4 = inlined_call_operand.vmem [shape: f32[32,32], index: 4, kind: input, shape index: {}]   ;;  %s1771_s5 = inlined_call_operand.vmem [shape: f32[1,32], index: 5, kind: input, shape index: {}]   ;;  %s1772_s6 = inlined_call_operand.vmem [shape: f32[32,32], index: 6, kind: input, shape index: {}]   ;;  %s1773_s7 = inlined_call_operand.vmem [shape: f32[1,32], index: 7, kind: input, shape index: {}]   ;;  %s1774_s8 = inlined_call_operand.vmem [shape: f32[32,32], index: 8, kind: input, shape index: {}]   ;;  %s1775_s9 = inlined_call_operand.vmem [shape: f32[32,288], index: 9, kind: input, shape index: {}]   ;;  %s1776_s10 = inlined_call_operand.vmem [shape: f32[32,1], index: 10, kind: input, shape index: {}]   ;;  %s1777_s11 = inlined_call_operand.vmem [shape: bf16[288,64], index: 11, kind: input, shape index: {}]   ;;  %s1778_s12 = inlined_call_operand.vmem [shape: f32[32,32], index: 12, kind: input, shape index: {}]   ;;  %s1779_s13 = inlined_call_operand.vmem [shape: f32[1,32], index: 13, kind: input, shape index: {}]   ;;  %s1780_s14 = inlined_call_operand.vmem [shape: f32[1,32], index: 14, kind: input, shape index: {}]   ;;  %s1781_s15 = inlined_call_operand.<no memory space> [shape: f32[1,1], index: 15, kind: input, shape index: {}]   ;;  %s1782_s16 = inlined_call_operand.hbm [shape: f32[2,1,64], index: 16, kind: output, shape index: {}]  }
   0x1   :  { %1786 = sst [smem:[#allocation9_spill]] %s1766_s0  ;;  %v21_v0 = vstv %s1781_s15 }
   0x2   :  { %1787 = sst [smem:[#allocation10_spill]] %s1768_s2  ;;  %22 = vst [vmem:[#allocation2] sm:$0x1] %v21_v0 }
   0x3   :  { %23 = vsyncpa [#allocation4], 0 }
   0x4   :  { %25 = vsyncpa [#allocation4 + $0x1], 0  ;;  %s1470_s23 = smov 0   ;;  %s1472_s24 = smov 0  }
   0x5   :  { %s1474_s25 = smov 0   ;;  %s1476_s26 = smov 0  }
   0x6 LB: > { %1788 = sst [smem:[#allocation6_spill]] %s1371_s25  ;;  %s1491_s15 = sadd.s32 4294967295, %s1375_s26   ;;  %s1375_s26 = sphi %s1476_s26, %s1795_s26   ;;  %s1371_s25 = sphi %s1474_s25, %s1797_s25   ;;  %s1367_s24 = sphi %s1472_s24, %s1799_s24   ;;  %s1363_s23 = sphi %s1470_s23, %s1798_s23  }
   0x7   : > { %s1152_s27 = sadd.s32 4294967294, %s1375_s26   ;;  %s1495_s28 = sadd.s32 1, %s1375_s26  }
   0x8   : > { %1789 = sst [smem:[#allocation7_spill]] %s1495_s28  ;;  %s384_s29 = sadd.s32 1, %s1371_s25 }
   0x9   : > { %s381_s30 = ssub.s32 %s1375_s26, %s1495_s28  ;;  %p394_p0 = scmp.ne.s32.totalorder %s1371_s25, %s1367_s24 }
   0xa   : > { %p382_p1 = scmp.eq.s32.totalorder %s381_s30, 0  ;;  %p395_p2 = scmp.eq.s32.totalorder %s1491_s15, 1 }
   0xb   : > { %p400_p3 = scmp.ne.s32.totalorder %s1367_s24, %s1363_s23  ;;  %p401_p4 = scmp.eq.s32.totalorder %s1152_s27, 1 }
   0xc   : > { %s1506_s0 = scalar_select %p382_p1, %s1371_s25, %s384_s29  }
   0xd   : > { %p1508_p5 = por %p395_p2, %p394_p0  ;;  %p1512_p6 = por %p401_p4, %p400_p3 }
   0xe   : > { %1790 = sst [smem:[#allocation8_spill]] %s1506_s0  ;;  %p1155_p7 = scmp.ge.s32.totalorder %s1375_s26, 1 }
   0xf   : > { %p473_p8 = scmp.lt.s32.totalorder %s1375_s26, 3 }
  0x11   : > { %p474_p9 = pnand %p1155_p7, %p473_p8 }
  0x12   : > { %p523_p10 = scmp.lt.s32.totalorder (!%p474_p9), %s1491_s15, 1  ;;  %s1793_s22 = sld [smem:[#allocation9_spill]] (!%p474_p9) }
  0x13   : > { %477 = sbr.rel (%p474_p9) target bundleno = 1068 (0x42c), region = 84  ;;  %s1794_s2 = sld [smem:[#allocation10_spill]] (!%p474_p9) }
  0x14   : > { %s1378_s30 = smov (!%p474_p9), 64   ;;  %s1087_s0 = scalar_lea.hbm (!%p474_p9), %s1782_s16, %s1491_s15 }
  0x18   : > { %s1520_s19 = scalar_select %p523_p10, %s1491_s15, 1  ;;  %vm543_vm0 = vcmask 253952   ;;  %v1377_v4 = vmov 32.0   ;;  %vm567_vm5 = vcmask 261120   ;;  %v540_v26 = vld [vmem:[%s1770_s4 + $0x18] sm:$0xff]  ;;  %v539_v27 = vld [vmem:[%s1770_s4 + $0x10] sm:$0xff] }
  0x19   : > { %1301 = vrcp.f32 %v1377_v4  ;;  %v535_v7 = vld [vmem:[%s1794_s2 + $0x18] sm:$0xff]  ;;  %v534_v9 = vld [vmem:[%s1794_s2 + $0x10] sm:$0xff]  ;;  %v533_v10 = vld [vmem:[%s1794_s2 + $0x8] sm:$0xff]  ;;  %610 = vmatpush.msra.mxu1 %v540_v26  ;;  %vm662_vm14 = vcmask 523264   ;;  %vm664_vm15 = vcmask 785408  }
  0x1a   : > { %s525_s27 = scalar_lea.vmem %s1793_s22, %s1520_s19  ;;  %583 = vmatpush.msra.mxu2 %v535_v7  ;;  %v532_v11 = vld [vmem:[%s1794_s2] sm:$0xff]  ;;  %v538_v28 = vld [vmem:[%s1770_s4 + $0x8] sm:$0xff]  ;;  %v626_v36 = vld [vmem:[%s1772_s6 + $0x18] sm:$0xff]  ;;  %s528_s25 = scalar_lea.vmem %s1767_s1, %s1520_s19 }
  0x1b   : > { %v530_v1 = vld [vmem:[%s525_s27] sm:$0x1]  ;;  %611 = vmatpush.msra.mxu1 %v539_v27  ;;  %v625_v37 = vld [vmem:[%s1772_s6 + $0x10] sm:$0xff]  ;;  %v624_v38 = vld [vmem:[%s1772_s6 + $0x8] sm:$0xff]  ;;  %s1379_s27 = smov 96   ;;  %s521_s22 = sand.u32 1, %s1367_s24  }
  0x1c   : > { %v542_v2 = vmul.f32 %v530_v1, %v530_v1  ;;  %584 = vmatpush.msra.mxu2 %v534_v9  ;;  %v537_v29 = vld [vmem:[%s1770_s4] sm:$0xff]  ;;  %v1026_v40 = vld [vmem:[%s1778_s12 + $0x18] sm:$0xff]  ;;  %v1025_v41 = vld [vmem:[%s1778_s12 + $0x10] sm:$0xff]  ;;  %s522_s29 = scalar_lea.vmem [#allocation3], %s521_s22  ;;  %s1091_s19 = sshll.u32 %s1087_s0, 4  ;;  %s1092_s19 = int_to_ptr.hbm [resolvable:$true] %s1091_s19 }
  0x1d   : > { %612 = vmatpush.msra.mxu1 %v538_v28  ;;  %v536_v30 = vld [vmem:[%s1769_s3] sm:$0x1]  ;;  %v1024_v42 = vld [vmem:[%s1778_s12 + $0x8] sm:$0xff]  ;;  %v668_v63 = vld [vmem:[%s1774_s8 + $0x10] sm:$0xff]  ;;  %s1079_s2 = scalar_lea.sflag [#allocation4], %s521_s22  ;;  %s1327_s28 = sshra.s32 %s1092_s19, 4  ;;  %s1328_s28 = int_to_ptr.hbm [resolvable:$true] %s1327_s28 }
  0x1e   : > { %v544_v3 = vsel %vm543_vm0, %v542_v2, 0.0  ;;  %585 = vmatpush.msra.mxu2 %v533_v10  ;;  %v623_v39 = vld [vmem:[%s1772_s6] sm:$0xff]  ;;  %v667_v56 = vld [vmem:[%s1774_s8 + $0x8] sm:$0xff]  ;;  %v669_v2 = vld [vmem:[%s1774_s8 + $0x18] sm:$0xff]  ;;  %s1329_s20 = scalar_lea.hbm %s1328_s28, 1  ;;  %p1334_p0 = scmp.lt.s32.totalorder %s1328_s28, %s1782_s16 }
  0x1f   : > { %545 = vadd.xlane.f32.xlu0 %v544_v3  ;;  %v1302_v5 = vpop.eup %1301  ;;  %613 = vmatpush.msra.mxu1 %v537_v29  ;;  %v1023_v43 = vld [vmem:[%s1778_s12] sm:$0xff]  ;;  %v1243_v7 = vld [vmem:[%s1777_s11 + $0x30] sm:$0xff]  ;;  %v1242_v9 = vld [vmem:[%s1777_s11 + $0x28] sm:$0xff]  ;;  %p1330_p11 = scmp.ne.s32.totalorder %s1328_s28, %s1329_s20 }
  0x20   : > { %v548_v6 = vmul.f32 32.0, %v1302_v5  ;;  %586 = vmatpush.msra.mxu2 %v532_v11  ;;  %vm552_vm1 = vweird.f32 %v1302_v5  ;;  %v541_v44 = vld [vmem:[%s1771_s5] sm:$0x1]  ;;  %v1250_v10 = vld [vmem:[%s1777_s11 + $0x68] sm:$0xff] }
  0x21   : > { %v531_v48 = vld [vmem:[%s528_s25] sm:$0x1]  ;;  %s1380_s25 = smov 32   ;;  %p1331_p12 = pnand %p1330_p11, %p1508_p5 }
  0x22   : > { %v549_v8 = vsub.f32 1.0, %v548_v6  ;;  %643 = vmatpush.msrb.mxu2 %v626_v36  ;;  %v627_v52 = vld [vmem:[%s1773_s7] sm:$0x1]  ;;  %v1252_v6 = vld [vmem:[%s1777_s11 + $0x78] sm:$0xff] }
  0x23   : > { %v666_v57 = vld [vmem:[%s1774_s8] sm:$0xff]  ;;  %969 = vmatpush.bf16.msra.mxu0 %v1252_v6  ;;  %p1332_p13 = pneg %p1331_p12 }
  0x24   : > { %v550_v12 = vmul.f32 %v1302_v5, %v549_v8  ;;  %644 = vmatpush.msrb.mxu2 %v625_v37  ;;  %v1251_v8 = vld [vmem:[%s1777_s11 + $0x70] sm:$0xff]  ;;  %v1241_v11 = vld [vmem:[%s1777_s11 + $0x20] sm:$0xff] }
  0x26   : > { %v551_v13 = vadd.f32 %v1302_v5, %v550_v12  ;;  %645 = vmatpush.msrb.mxu2 %v624_v38  ;;  %v1249_v12 = vld [vmem:[%s1777_s11 + $0x60] sm:$0xff] }
  0x27   : > { %970 = vmatpush.bf16.msra.mxu0 %v1251_v8 }
  0x28   : > { %v553_v14 = vsel %vm552_vm1, %v1302_v5, %v551_v13  ;;  %646 = vmatpush.msrb.mxu2 %v623_v39  ;;  %v1244_v5 = vld [vmem:[%s1777_s11 + $0x38] sm:$0xff]  ;;  %v1254_v13 = vld [vmem:[%s1777_s11 + $0x88] sm:$0xff] }
  0x29   : > { %950 = vmatpush.bf16.msra.mxu3 %v1244_v5  ;;  %994 = vmatpush.bf16.msrb.mxu1 %v1254_v13  ;;  %v1053_v13 = vld [vmem:[#allocation2] sm:$0x1] }
  0x2b   : > { %971 = vmatpush.bf16.msra.mxu0 %v1250_v10 }
  0x2d   : > { %951 = vmatpush.bf16.msra.mxu3 %v1243_v7 }
  0x2f   : > { %972 = vmatpush.bf16.msra.mxu0 %v1249_v12 }
  0x31   : > { %952 = vmatpush.bf16.msra.mxu3 %v1242_v9 }
  0x35   : > { %953 = vmatpush.bf16.msra.mxu3 %v1241_v11 }
  0x92   : > { %v546_v15 = vpop.xlane.xlu0 %545 }
  0x93   : > { %v554_v16 = vmul.f32 %v553_v14, %v546_v15  ;;  %v1240_v14 = vld [vmem:[%s1777_s11 + $0x18] sm:$0xff] }
  0x94   : > { %v1248_v15 = vld [vmem:[%s1777_s11 + $0x58] sm:$0xff]  ;;  %954 = vmatpush.bf16.msra.mxu3 %v1240_v14  ;;  %v814_v14 = vld [vmem:[%s1776_s10 + $0x10] sm:$0xff] }
  0x95   : > { %v555_v17 = vadd.f32 1e-08, %v554_v16  ;;  %v1253_v16 = vld [vmem:[%s1777_s11 + $0x80] sm:$0xff]  ;;  %973 = vmatpush.bf16.msra.mxu0 %v1248_v15 }
  0x96   : > { %995 = vmatpush.bf16.msrb.mxu1 %v1253_v16 }
  0x97   : > { %1303 = vrsqrt.f32 %v555_v17  ;;  %vm562_vm3 = vweird.f32 %v555_v17 }
  0x9d   : > { %v1304_v18 = vpop.eup %1303 }
  0x9e   : > { %v557_v19 = vmul.f32 %v1304_v18, %v555_v17  ;;  %vm563_vm2 = vweird.f32 %v1304_v18  ;;  %v1239_v17 = vld [vmem:[%s1777_s11 + $0x10] sm:$0xff] }
  0x9f   : > { %vm564_vm4 = vmor %vm562_vm3, %vm563_vm2  ;;  %955 = vmatpush.bf16.msra.mxu3 %v1239_v17 }
  0xa0   : > { %v558_v20 = vmul.f32 %v1304_v18, %v557_v19  ;;  %v1238_v19 = vld [vmem:[%s1777_s11 + $0x8] sm:$0xff] }
  0xa2   : > { %v559_v21 = vmul.f32 0.5, %v558_v20  ;;  %v1246_v20 = vld [vmem:[%s1777_s11 + $0x48] sm:$0xff] }
  0xa3   : > { %956 = vmatpush.bf16.msra.mxu3 %v1238_v19 }
  0xa4   : > { %v560_v22 = vsub.f32 1.5, %v559_v21  ;;  %v1237_v21 = vld [vmem:[%s1777_s11] sm:$0xff] }
  0xa6   : > { %v561_v23 = vmul.f32 %v1304_v18, %v560_v22  ;;  %v1245_v22 = vld [vmem:[%s1777_s11 + $0x40] sm:$0xff] }
  0xa7   : > { %957 = vmatpush.bf16.msra.mxu3 %v1237_v21 }
  0xa8   : > { %v565_v24 = vsel %vm564_vm4, %v1304_v18, %v561_v23  ;;  %v1247_v18 = vld [vmem:[%s1777_s11 + $0x50] sm:$0xff] }
  0xa9   : > { %v566_v25 = vmul.f32 %v565_v24, %v530_v1  ;;  %974 = vmatpush.bf16.msra.mxu0 %v1247_v18 }
  0xab   : > { %1156 = vmatmul.msk.f32.vlgmr.msra.gmra.mxu2 %vm567_vm5, %v566_v25 }
  0xac   : > { %1040 = vmatpush.msra.mxu2 %v1026_v40  ;;  %v737_v40 = vld [vmem:[%s1775_s9 + $0x28] sm:$0xff] }
  0xad   : > { %975 = vmatpush.bf16.msra.mxu0 %v1246_v20 }
  0xae   : > { %1041 = vmatpush.msra.mxu2 %v1025_v41 }
  0xb0   : > { %1042 = vmatpush.msra.mxu2 %v1024_v42  ;;  %v734_v42 = vld [vmem:[%s1775_s9 + $0x10] sm:$0xff] }
  0xb1   : > { %976 = vmatpush.bf16.msra.mxu0 %v1245_v22 }
  0xb2   : > { %1043 = vmatpush.msra.mxu2 %v1023_v43 }
 0x12e   : > { %v588_v31 = vpop.f32.mrf.mxu2 }
 0x12f   : > { %v589_v32 = vadd.f32 %v588_v31, %v536_v30 }
 0x131   : > { %vm591_vm6 = vcmp.ge.f32.partialorder %v589_v32, 0.0  ;;  %v592_v33 = vmul.f32 0.2, %v589_v32 }
 0x133   : > { %v593_v34 = vsel %vm591_vm6, %v589_v32, %v592_v33  ;;  %v1381_v33 = vmov 0  }
 0x134   : > { %v594_v35 = vmul.f32 1.4142135, %v593_v34  ;;  %1300 = vset.pattern.permute.xlu1 %v1381_v33  ;;  %v815_v34 = vld [vmem:[%s1776_s10 + $0x18] sm:$0xff]  ;;  %1299 = vset.pattern.permute.xlu0 %v1381_v33  ;;  %v742_v33 = vld [vmem:[%s1775_s9 + $0x50] sm:$0xff] }
 0x136   : > { %1157 = vmatmul.msk.f32.vlgmr.msra.gmra.mxu1 %vm567_vm5, %v594_v35 }
 0x1b3   : > { %v615_v45 = vpop.f32.mrf.mxu1 }
 0x1b4   : > { %v616_v46 = vadd.f32 %v615_v45, %v541_v44 }
 0x1b6   : > { %vm618_vm7 = vcmp.ge.f32.partialorder %v616_v46, 0.0  ;;  %v619_v47 = vmul.f32 0.2, %v616_v46 }
 0x1b8   : > { %v620_v49 = vsel %vm618_vm7, %v616_v46, %v619_v47 }
 0x1b9   : > { %v621_v50 = vmul.f32 1.4142135, %v620_v49 }
 0x1bb   : > { %v622_v51 = vadd.f32 %v621_v50, %v531_v48  ;;  %v812_v50 = vld [vmem:[%s1776_s10] sm:$0xff] }
 0x1bd   : > { %1158 = vmatmul.msk.f32.vlgmr.msrb.gmra.mxu2 %vm567_vm5, %v622_v51 }
 0x1c5   : > { %1233 = vmatmul.msk.f32.vlgmr.msra.gmra.mxu2 %vm567_vm5, %v622_v51 }
 0x240   : > { %v648_v53 = vpop.f32.mrf.mxu2 }
 0x241   : > { %v1591_v54 = vadd.f32 %v648_v53, %v627_v52 }
 0x243   : > { %655 = vrot.lane.b32.xlu2 %v1591_v54, %s1378_s30  ;;  %v670_v55 = vmul.f32 %v1591_v54, %v1591_v54  ;;  %v1672_v36 = vperm.slane %v1591_v54, 0  ;;  %s1089_s30 = sshll.u32 %s522_s29, 4  ;;  %s1090_s30 = int_to_ptr.vmem [resolvable:$true] %s1089_s30 }
 0x245   : > { %v671_v58 = vperm.slane %v670_v55, 0  ;;  %v751_v45 = vmul.f32 %v1672_v36, %v737_v40  ;;  %v748_v47 = vmul.f32 %v1672_v36, %v734_v42 }
 0x247   : > { %v673_v59 = vmul.f32 %v671_v58, %v667_v56  ;;  %v672_v60 = vmul.f32 %v671_v58, %v666_v57  ;;  %v674_v0 = vmul.f32 %v671_v58, %v668_v63  ;;  %v675_v3 = vmul.f32 %v671_v58, %v669_v2  ;;  %v733_v63 = vld [vmem:[%s1775_s9 + $0x8] sm:$0xff] }
 0x249   : > { %v679_v61 = vsel %vm567_vm5, %v673_v59, 0.0  ;;  %v676_v62 = vsel %vm567_vm5, %v672_v60, 0.0  ;;  %v682_v1 = vsel %vm567_vm5, %v674_v0, 0.0  ;;  %v685_v4 = vsel %vm567_vm5, %v675_v3, 0.0  ;;  %v732_v60 = vld [vmem:[%s1775_s9] sm:$0xff] }
 0x24a   : > { %680 = vadd.xlane.f32.xlu1 %v679_v61  ;;  %677 = vadd.xlane.f32.xlu0 %v676_v62  ;;  %v735_v62 = vld [vmem:[%s1775_s9 + $0x18] sm:$0xff] }
 0x24b   : > { %658 = vrot.lane.b32.xlu2 %v1591_v54, %s1379_s27  ;;  %s1333_s27 = scalar_lea.hbm %s1782_s16, 2 }
 0x24c   : > { %p1335_p1 = scmp.lt.s32.totalorder %s1333_s27, %s1329_s20 }
 0x24e   : > { %p1336_p2 = por %p1335_p1, %p1334_p0 }
 0x250   : > { %p1337_p3 = pnand %p1336_p2, %p1332_p13 }
 0x252   : > { %683 = vadd.xlane.f32.xlu0 %v682_v1  ;;  %v813_v1 = vld [vmem:[%s1776_s10 + $0x8] sm:$0xff] }
 0x263   : > { %652 = vrot.lane.b32.xlu1 %v1591_v54, %s1380_s25 }
 0x266   : > { %828 = vperm.xlu0 %1299, %v814_v14  }
 0x26b   : > { %833 = vperm.xlu1 %1300, %v815_v34  }
 0x273   : > { %818 = vperm.xlu1 %1300, %v812_v50  }
 0x274   : > { %686 = vadd.xlane.f32.xlu2 %v685_v4 }
 0x27b   : > { %823 = vperm.xlu1 %1300, %v813_v1  }
 0x283   : > { %1056 = vperm.xlu1 %1300, %v1053_v13  }
 0x29d   : > { %v656_v38 = vpop.permute.xlu2 %655 }
 0x2a5   : > { %v659_v58 = vpop.permute.xlu2 %658 }
 0x2bd   : > { %v681_v23 = vpop.xlane.xlu1 %680  ;;  %v678_v24 = vpop.xlane.xlu0 %677 }
 0x2be   : > { %v689_v25 = vadd.f32 1e-08, %v681_v23  ;;  %v688_v26 = vadd.f32 1e-08, %v678_v24 }
 0x2c0   : > { %1305 = vrsqrt.f32 %v689_v25  ;;  %vm708_vm10 = vweird.f32 %v689_v25  ;;  %vm698_vm12 = vweird.f32 %v688_v26 }
 0x2c1   : > { %1307 = vrsqrt.f32 %v688_v26 }
 0x2c5   : > { %v684_v51 = vpop.xlane.xlu0 %683 }
 0x2c6   : > { %v1306_v27 = vpop.eup %1305  ;;  %v690_v56 = vadd.f32 1e-08, %v684_v51 }
 0x2c7   : > { %v1308_v28 = vpop.eup %1307  ;;  %v703_v29 = vmul.f32 %v1306_v27, %v689_v25  ;;  %vm709_vm8 = vweird.f32 %v1306_v27  ;;  %v738_v25 = vld [vmem:[%s1775_s9 + $0x30] sm:$0xff] }
 0x2c8   : > { %v693_v30 = vmul.f32 %v1308_v28, %v688_v26  ;;  %vm699_vm9 = vweird.f32 %v1308_v28  ;;  %vm710_vm11 = vmor %vm708_vm10, %vm709_vm8  ;;  %1309 = vrsqrt.f32 %v690_v56  ;;  %vm718_vm1 = vweird.f32 %v690_v56 }
 0x2c9   : > { %v704_v31 = vmul.f32 %v1306_v27, %v703_v29  ;;  %vm700_vm13 = vmor %vm698_vm12, %vm699_vm9  ;;  %v743_v29 = vld [vmem:[%s1775_s9 + $0x58] sm:$0xff] }
 0x2ca   : > { %v694_v32 = vmul.f32 %v1308_v28, %v693_v30 }
 0x2cb   : > { %v705_v35 = vmul.f32 0.5, %v704_v31  ;;  %v741_v31 = vld [vmem:[%s1775_s9 + $0x48] sm:$0xff] }
 0x2cc   : > { %v695_v37 = vmul.f32 0.5, %v694_v32 }
 0x2cd   : > { %v706_v39 = vsub.f32 1.5, %v705_v35 }
 0x2ce   : > { %v696_v41 = vsub.f32 1.5, %v695_v37  ;;  %v1310_v12 = vpop.eup %1309 }
 0x2cf   : > { %v707_v43 = vmul.f32 %v1306_v27, %v706_v39  ;;  %v713_v15 = vmul.f32 %v1310_v12, %v690_v56  ;;  %vm719_vm0 = vweird.f32 %v1310_v12 }
 0x2d0   : > { %v697_v44 = vmul.f32 %v1308_v28, %v696_v41  ;;  %vm720_vm2 = vmor %vm718_vm1, %vm719_vm0  ;;  %v757_v41 = vmul.f32 %v1672_v36, %v743_v29 }
 0x2d1   : > { %v711_v46 = vsel %vm710_vm11, %v1306_v27, %v707_v43  ;;  %v714_v17 = vmul.f32 %v1310_v12, %v713_v15  ;;  %v739_v27 = vld [vmem:[%s1775_s9 + $0x38] sm:$0xff]  ;;  %vm1076_vm11 = vcmask 516096  }
 0x2d2   : > { %v701_v48 = vsel %vm700_vm13, %v1308_v28, %v697_v44  ;;  %v763_v49 = vmul.f32 %v751_v45, %v711_v46  ;;  %v740_v28 = vld [vmem:[%s1775_s9 + $0x40] sm:$0xff] }
 0x2d3   : > { %v760_v52 = vmul.f32 %v748_v47, %v701_v48  ;;  %v715_v19 = vmul.f32 0.5, %v714_v17 }
 0x2d5   : > { %v653_v53 = vpop.permute.xlu1 %652  ;;  %v772_v55 = vpack.c.bf16 %v763_v49, %v760_v52  ;;  %v716_v21 = vsub.f32 1.5, %v715_v19 }
 0x2d6   : > { %v661_v57 = vsel %vm567_vm5, %v1591_v54, %v653_v53  ;;  %v736_v54 = vld [vmem:[%s1775_s9 + $0x20] sm:$0xff] }
 0x2d7   : > { %v663_v59 = vsel %vm662_vm14, %v661_v57, %v656_v38  ;;  %1231 = vmatmul.msk.bf16.vlgmr.msrb.gmra.mxu1 %vm567_vm5, %v772_v55  ;;  %v717_v24 = vmul.f32 %v1310_v12, %v716_v21  ;;  %v754_v38 = vmul.f32 %v1672_v36, %v740_v28  ;;  %v1045_v21 = vpop.f32.mrf.mxu2  ;;  %v1048_v28 = vld [vmem:[%s1780_s14] sm:$0x1] }
 0x2d8   : > { %v665_v61 = vsel %vm664_vm15, %v663_v59, %v659_v58 }
 0x2d9   : > { %v744_v0 = vperm.slane %v665_v61, 0  ;;  %v721_v34 = vsel %vm720_vm2, %v1310_v12, %v717_v24  ;;  %v829_v61 = vpop.permute.xlu0 %828 }
 0x2da   : > { %v766_v44 = vmul.f32 %v754_v38, %v721_v34 }
 0x2db   : > { %v746_v2 = vmul.f32 %v744_v0, %v732_v60  ;;  %v749_v3 = vmul.f32 %v744_v0, %v735_v62  ;;  %v747_v4 = vmul.f32 %v744_v0, %v733_v63  ;;  %v750_v5 = vmul.f32 %v744_v0, %v736_v54 }
 0x2dc   : > { %v752_v32 = vmul.f32 %v744_v0, %v738_v25  ;;  %v753_v35 = vmul.f32 %v744_v0, %v739_v27  ;;  %v755_v39 = vmul.f32 %v744_v0, %v741_v31  ;;  %v756_v40 = vmul.f32 %v744_v0, %v742_v33 }
 0x2dd   : > { %v758_v6 = vmul.f32 %v746_v2, %v701_v48  ;;  %v761_v7 = vmul.f32 %v749_v3, %v711_v46  ;;  %v759_v8 = vmul.f32 %v747_v4, %v701_v48  ;;  %v762_v9 = vmul.f32 %v750_v5, %v711_v46  ;;  %v834_v52 = vpop.permute.xlu1 %833 }
 0x2de   : > { %v764_v43 = vmul.f32 %v752_v32, %v721_v34  ;;  %v765_v46 = vmul.f32 %v753_v35, %v721_v34 }
 0x2df   : > { %v770_v10 = vpack.c.bf16 %v761_v7, %v758_v6  ;;  %v771_v11 = vpack.c.bf16 %v762_v9, %v759_v8 }
 0x2e1   : > { %958 = vmatmul.bf16.vlgmr.msra.gmra.mxu3 %v770_v10  ;;  %977 = vmatmul.bf16.vlgmr.msra.gmra.mxu0 %v771_v11 }
 0x2e5   : > { %v819_v57 = vpop.permute.xlu1 %818 }
 0x2e7   : > { %v687_v16 = vpop.xlane.xlu2 %686 }
 0x2e8   : > { %v691_v18 = vadd.f32 1e-08, %v687_v16 }
 0x2ea   : > { %1311 = vrsqrt.f32 %v691_v18  ;;  %vm728_vm4 = vweird.f32 %v691_v18 }
 0x2ed   : > { %v824_v60 = vpop.permute.xlu1 %823 }
 0x2f0   : > { %v1312_v20 = vpop.eup %1311 }
 0x2f1   : > { %v723_v22 = vmul.f32 %v1312_v20, %v691_v18  ;;  %vm729_vm3 = vweird.f32 %v1312_v20 }
 0x2f2   : > { %vm730_vm6 = vmor %vm728_vm4, %vm729_vm3 }
 0x2f3   : > { %v724_v23 = vmul.f32 %v1312_v20, %v723_v22 }
 0x2f5   : > { %v725_v26 = vmul.f32 0.5, %v724_v23  ;;  %v1057_v35 = vpop.permute.xlu1 %1056 }
 0x2f7   : > { %v726_v30 = vsub.f32 1.5, %v725_v26 }
 0x2f9   : > { %v727_v37 = vmul.f32 %v1312_v20, %v726_v30 }
 0x2fb   : > { %v731_v42 = vsel %vm730_vm6, %v1312_v20, %v727_v37  ;;  %v1027_v20 = vld [vmem:[%s1779_s13] sm:$0x1]  ;;  %v1059_v37 = vperm.slane %v1057_v35, 0 }
 0x2fc   : > { %v767_v45 = vmul.f32 %v755_v39, %v731_v42  ;;  %v768_v47 = vmul.f32 %v756_v40, %v731_v42  ;;  %v769_v48 = vmul.f32 %v757_v41, %v731_v42  ;;  %v1046_v26 = vadd.f32 %v1045_v21, %v1027_v20 }
 0x2fe   : > { %v773_v49 = vpack.c.bf16 %v767_v45, %v764_v43  ;;  %v774_v50 = vpack.c.bf16 %v768_v47, %v765_v46  ;;  %v775_v51 = vpack.c.bf16 %v769_v48, %v766_v44  ;;  %v1049_v32 = vmul.f32 %v1048_v28, %v1046_v26 }
 0x300   : > { %963 = vmatmul.bf16.gmra.mxu3 %v773_v49  ;;  %982 = vmatmul.bf16.gmra.mxu0 %v774_v50  ;;  %v1050_v34 = vpack.c.bf16 %v1049_v32, %v1049_v32 }
 0x301   : > { %1232 = vmatmul.msk.bf16.gmra.mxu1 %vm567_vm5, %v775_v51 }
 0x354   : > { %v997_v56 = vpop.f32.mrf.mxu1 }
 0x35c   : > { %v999_v59 = vpop.f32.mrf.mxu1 }
 0x35e   : > { %v978_v53 = vpop.f32.mrf.mxu0 }
 0x364   : > { %v959_v55 = vpop.f32.mrf.mxu3 }
 0x365   : > { %v960_v2 = vadd.f32 %v959_v55, %v819_v57 }
 0x366   : > { %v980_v36 = vpop.f32.mrf.mxu0 }
 0x367   : > { %v979_v5 = vadd.f32 %v978_v53, %v960_v2 }
 0x369   : > { %v998_v11 = vadd.f32 %v997_v56, %v979_v5 }
 0x36b   : > { %v1011_v17 = vmul.f32 0.2, %v998_v11  ;;  %vm1007_vm10 = vcmp.ge.f32.partialorder %v998_v11, 0.0 }
 0x36c   : > { %v961_v58 = vpop.f32.mrf.mxu3 }
 0x36d   : > { %v962_v54 = vadd.f32 %v961_v58, %v824_v60  ;;  %v1015_v27 = vsel %vm1007_vm10, %v998_v11, %v1011_v17 }
 0x36e   : > { %v1019_v31 = vmul.f32 1.4142135, %v1015_v27 }
 0x36f   : > { %v981_v4 = vadd.f32 %v980_v36, %v962_v54 }
 0x371   : > { %v1000_v8 = vadd.f32 %v999_v59, %v981_v4 }
 0x373   : > { %v1012_v15 = vmul.f32 0.2, %v1000_v8  ;;  %vm1008_vm8 = vcmp.ge.f32.partialorder %v1000_v8, 0.0 }
 0x375   : > { %v1016_v23 = vsel %vm1008_vm8, %v1000_v8, %v1012_v15 }
 0x376   : > { %v1020_v30 = vmul.f32 1.4142135, %v1016_v23 }
 0x378   : > { %v1051_v33 = vpack.c.bf16 %v1020_v30, %v1019_v31 }
 0x37d   : > { %v983_v62 = vpop.f32.mrf.mxu0 }
 0x37e   : > { %v1002_v1 = vpop.f32.mrf.mxu1 }
 0x383   : > { %v964_v63 = vpop.f32.mrf.mxu3 }
 0x384   : > { %v965_v0 = vadd.f32 %v964_v63, %v829_v61 }
 0x385   : > { %v985_v10 = vpop.f32.mrf.mxu0 }
 0x386   : > { %v984_v3 = vadd.f32 %v983_v62, %v965_v0  ;;  %v1004_v14 = vpop.f32.mrf.mxu1 }
 0x388   : > { %v1003_v6 = vadd.f32 %v1002_v1, %v984_v3 }
 0x38a   : > { %v1013_v12 = vmul.f32 0.2, %v1003_v6  ;;  %vm1009_vm7 = vcmp.ge.f32.partialorder %v1003_v6, 0.0 }
 0x38b   : > { %v966_v7 = vpop.f32.mrf.mxu3 }
 0x38c   : > { %v967_v9 = vadd.f32 %v966_v7, %v834_v52  ;;  %v1017_v18 = vsel %vm1009_vm7, %v1003_v6, %v1013_v12 }
 0x38d   : > { %v1021_v24 = vmul.f32 1.4142135, %v1017_v18 }
 0x38e   : > { %v986_v13 = vadd.f32 %v985_v10, %v967_v9 }
 0x390   : > { %v1005_v16 = vadd.f32 %v1004_v14, %v986_v13 }
 0x392   : > { %vm1010_vm9 = vcmp.ge.f32.partialorder %v1005_v16, 0.0  ;;  %v1014_v19 = vmul.f32 0.2, %v1005_v16 }
 0x394   : > { %v1018_v22 = vsel %vm1010_vm9, %v1005_v16, %v1014_v19 }
 0x395   : > { %v1022_v25 = vmul.f32 1.4142135, %v1018_v22 }
 0x397   : > { %v1052_v29 = vpack.c.bf16 %v1022_v25, %v1021_v24 }
 0x399   : > { %1069 = vmatpush.bf16.msrb.mxu2 %v1052_v29 }
 0x39d   : > { %1070 = vmatpush.bf16.msrb.mxu2 %v1051_v33 }
 0x3a0   : > { %1234 = vmatmul.msk.bf16.vlgmr.msrb.gmra.mxu2 %vm567_vm5, %v1050_v34 }
 0x423   : > { %v1072_v38 = vpop.f32.mrf.mxu2 }
 0x424   : > { %v1073_v39 = vadd.f32 %v1072_v38, %v1059_v37 }
 0x426   : > { %1077 = vst.msk [vmem:[%s522_s29] sm:$0x1] %vm1076_vm11, %v1073_v39 }
 0x427   : > { %1340 = shalt.err (!%p1337_p3)
}
 0x428   : > { %1255 = dma.vmem_to_hbm [thread:$0]  (%p1508_p5), %s1090_s30, 16, %s1092_s19, %s1079_s2  }
 0x42b   : > { %v1074_v40 = vpop.f32.mrf.mxu2 }
 0x42c PF: > { %p1261_p4 = scmp.ge.s32.totalorder %s1375_s26, 2  ;;  %s1103_s22 = sand.u32 1, %s1363_s23  }
 0x42d   : > { %s1104_s29 = scalar_lea.sflag [#allocation4], %s1103_s22 }
 0x42e   : > { %p1258_p7 = pnand %p1261_p4, %p1512_p6 }
 0x430   : > { %p1259_p8 = pneg %p1258_p7 }
 0x432   : > { %1358 = dma.done.wait (%p1259_p8), %s1104_s29, 16  }
 0x433   : > { %1360 = vsyncadd (%p1259_p8), %s1104_s29, 4294967280  ;;  %s1795_s26 = sld [smem:[#allocation7_spill]]  ;;  %s1798_s23 = smov %s1367_s24 }
 0x434   : > { %s1796_s28 = sld [smem:[#allocation6_spill]] }
 0x435   : > { %s1797_s25 = sld [smem:[#allocation8_spill]] }
 0x439   : > { %p28_p9 = scmp.ge.s32.totalorder %s1795_s26, 4  }
 0x43a   : > { %s1799_s24 = smov %s1796_s28 }
 0x43b   :  { %30 = sbr.rel (!%p28_p9) target bundleno = 6 (0x6), region = 122 }
 0x440   :  { %1109 = vsyncpa [#allocation4], 1 }
 0x441   :  { %1111 = vsyncpa [#allocation4 + $0x1], 1 }

</bundles_post_ra>
